<compile_context>
chip_gen: v5e
topology: v5e:2x2
jax: 0.10.0
libtpu: 0.0.40
codegen_flags: <defaults>
</compile_context>

<pallas_src>
import math
from functools import partial

import jax
import jax.numpy as jnp
import numpy as np
from jax.experimental import pallas as pl
from jax.experimental.pallas import tpu as pltpu

NEG_SLOPE = 0.01  # nn.LeakyReLU default
LANE = 128


def _round_up(n, m):
    return ((n + m - 1) // m) * m


# ------------------ fused LSTM + LeakyReLU + Linear kernel ------------------
def _ner_net_kernel(x_ref, wih_ref, whh_ref, bl_ref, wlin_ref, blin_ref,
                    h_out_ref, y_ref, *, seq_len):
    T = seq_len
    if T == 1:
        B, _, D = x_ref.shape                 # x is (B, 1, D)
    else:
        _, B, D = x_ref.shape                 # x is time-major (T, B, D)
    H = whh_ref.shape[0]

    # Hoisted input projection: one MXU matmul for ALL timesteps.
    if T == 1:
        x_proj = (jnp.dot(x_ref[...].reshape(B, D), wih_ref[...],
                          preferred_element_type=jnp.float32)
                  + bl_ref[...])                       # (B, 4H)
    else:
        # Time-major so x_proj[t] below is a zero-cost leading-axis view.
        x_proj = (jnp.dot(x_ref[...].reshape(T * B, D), wih_ref[...],
                          preferred_element_type=jnp.float32)
                  + bl_ref[...]).reshape(T, B, 4 * H)

    # Single-tanh gate trick: sigmoid(x) = 0.5*tanh(0.5*x) + 0.5, so i/f/o lanes
    # are pre-scaled by 0.5 and recovered with one fused multiply-add; g lanes pass
    # through untouched. One EUP pass per step instead of two. (Constants hoisted.)
    lane = jax.lax.broadcasted_iota(jnp.int32, (B, 4 * H), 1)
    is_g = (lane >= 2 * H) & (lane < 3 * H)
    scale = jnp.where(is_g, 1.0, 0.5).astype(jnp.float32)
    offset = jnp.where(is_g, 0.0, 0.5).astype(jnp.float32)

    w_hh = whh_ref[...]
    h = None
    c = None
    outs = []
    # TODO(synk): for long sequences replace this static unroll with lax.fori_loop
    # (h/c in VMEM scratch) and hold w_hh in the MXU across steps via
    # pltpu.matmul_push_rhs / matmul_acc_lhs / matmul_pop.
    for t in range(T):  # T is small & static -> fully unrolled, all indices static
        xp = x_proj if T == 1 else x_proj[t]
        if t == 0:
            gates = xp                                   # h0 == 0: skip recurrent matmul
        else:
            gates = xp + jnp.dot(h, w_hh, preferred_element_type=jnp.float32)
        acts = jnp.tanh(gates * scale) * scale + offset  # [sig(i), sig(f), tanh(g), sig(o)]
        i_g = acts[:, 0 * H:1 * H]
        f_g = acts[:, 1 * H:2 * H]
        g_g = acts[:, 2 * H:3 * H]
        o_g = acts[:, 3 * H:4 * H]
        c = i_g * g_g if t == 0 else f_g * c + i_g * g_g  # c0 == 0
        h = o_g * jnp.tanh(c)
        outs.append(jnp.where(h >= 0, h, NEG_SLOPE * h))  # fused LeakyReLU, in registers

    if T == 1:
        h_act = outs[0]                      # (B, H)
        h_flat = h_act
    else:
        h_act = jnp.stack(outs, axis=1)      # (B, T, H)
        h_flat = h_act.reshape(B * T, H)

    h_out_ref[...] = h_act                   # ONE dense store after the loop

    # Fused Flatten -> Dropout(identity) -> Linear on the register-resident value.
    # Output last dim was padded to 128 lanes at setup time (unmasked vst).
    y_ref[...] = (jnp.dot(h_flat, wlin_ref[...],
                          preferred_element_type=jnp.float32)
                  + blin_ref[...])


# --------------------------------- wrapper ---------------------------------
def prepare_params(raw_params):
    """One-time setup: pad the Linear layer to a lane-dense 128-wide output."""
    tags = raw_params["w_lin"].shape[1]
    tags_pad = _round_up(tags, LANE)
    p = dict(raw_params)
    p["w_lin"] = jnp.pad(raw_params["w_lin"], ((0, 0), (0, tags_pad - tags)))
    p["b_lin"] = jnp.pad(raw_params["b_lin"], ((0, 0), (0, tags_pad - tags)))
    return p, tags


def ner_net_forward(x, params, *, tags):
    """x: (B, T, D) batch-first like the PyTorch module. Returns (y, h)."""
    B, T, D = x.shape
    H = params["w_hh"].shape[0]
    tags_pad = params["w_lin"].shape[1]

    if T == 1:
        x_in = x                              # (B, 1, D); squeezed inside the kernel
        h_shape = (B, H)                      # matches x[0].squeeze(1) in LstmFlatten
    else:
        x_in = jnp.transpose(x, (1, 0, 2))    # time-major (T, B, D), one-time transpose
        h_shape = (B, T, H)

    flops = (2 * B * T * D * 4 * H            # input projection
             + 2 * B * (T - 1) * H * 4 * H    # recurrent matmuls (t > 0)
             + 2 * B * T * H * tags_pad)      # final linear
    transcendentals = 5 * B * T * H           # tanh(B,4H) + tanh(B,H) per step
    bytes_accessed = 4 * (B * T * D + D * 4 * H + H * 4 * H + 4 * H
                          + H * tags_pad + tags_pad + B * T * H + B * T * tags_pad)

    vmem = pltpu.MemorySpace.VMEM
    # TODO(synk): when B*T scales, add a batch grid with
    # dimension_semantics=("parallel",) (2 TCs on v7x) and set vmem_limit_bytes
    # against v7x's smaller 64 MiB VMEM; today everything is a few hundred KiB.
    h_out, y_pad = pl.pallas_call(
        partial(_ner_net_kernel, seq_len=T),
        out_shape=(
            jax.ShapeDtypeStruct(h_shape, jnp.float32),
            jax.ShapeDtypeStruct((B * T, tags_pad), jnp.float32),
        ),
        in_specs=[pl.BlockSpec(memory_space=vmem) for _ in range(6)],
        out_specs=(
            pl.BlockSpec(memory_space=vmem),
            pl.BlockSpec(memory_space=vmem),
        ),
        cost_estimate=pl.CostEstimate(
            flops=flops,
            transcendentals=transcendentals,
            bytes_accessed=bytes_accessed,
        ),
    )(x_in, params["w_ih"], params["w_hh"], params["b_lstm"],
      params["w_lin"], params["b_lin"])

    y = y_pad[:, :tags]
    return y, h_out


# ------------------------------ reference (pure JAX) ------------------------------
def ner_net_reference(x, params):
    B, T, D = x.shape
    H = params["w_hh"].shape[0]
    h = jnp.zeros((B, H), jnp.float32)
    c = jnp.zeros((B, H), jnp.float32)
    outs = []
    for t in range(T):
        gates = x[:, t, :] @ params["w_ih"] + h @ params["w_hh"] + params["b_lstm"]
        i = jax.nn.sigmoid(gates[:, :H])
        f = jax.nn.sigmoid(gates[:, H:2 * H])
        g = jnp.tanh(gates[:, 2 * H:3 * H])
        o = jax.nn.sigmoid(gates[:, 3 * H:])
        c = f * c + i * g
        h = o * jnp.tanh(c)
        outs.append(h)
    out = jnp.stack(outs, axis=1)  # (B, T, H)
    if T == 1:
        out = out[:, 0, :]
    h_act = jnp.where(out >= 0, out, NEG_SLOPE * out)
    y = h_act.reshape(-1, H) @ params["w_lin"] + params["b_lin"]
    return y, h_act


# ------------------------------------- main -------------------------------------
if __name__ == "__main__":
    # args.emb_dim = 32, tags = 5; B = 8 tokens, seq-len 1 (the squeeze(1) path).
    B, T, D, H, TAGS = 8, 1, 32, 32, 5

    key = jax.random.PRNGKey(0)
    kx, k1, k2, k3, k4, k5, k6, kx2 = jax.random.split(key, 8)
    bound = 1.0 / math.sqrt(H)

    raw_params = {
        # LSTM weights stored pre-transposed: (in_features, 4H), PyTorch gate order [i,f,g,o]
        "w_ih": jax.random.uniform(k1, (D, 4 * H), jnp.float32, -bound, bound),
        "w_hh": jax.random.uniform(k2, (H, 4 * H), jnp.float32, -bound, bound),
        # b_ih + b_hh folded into one (1, 4H) bias
        "b_lstm": (
            jax.random.uniform(k3, (1, 4 * H), jnp.float32, -bound, bound)
            + jax.random.uniform(k4, (1, 4 * H), jnp.float32, -bound, bound)
        ),
        "w_lin": jax.random.uniform(k5, (H, TAGS), jnp.float32, -bound, bound),
        "b_lin": jax.random.uniform(k6, (1, TAGS), jnp.float32, -bound, bound),
    }

    params, tags = prepare_params(raw_params)  # pad Linear to 128 lanes ONCE
    fwd = jax.jit(ner_net_forward, static_argnames=("tags",))

    # Primary (shipped) config: T = 1.
    x = jax.random.normal(kx, (B, T, D), jnp.float32)
    y, h = fwd(x, params, tags=tags)
    y = jax.block_until_ready(y)
    h = jax.block_until_ready(h)
    y_ref, h_ref = ner_net_reference(x, raw_params)
    np.testing.assert_allclose(np.asarray(y), np.asarray(y_ref), rtol=1e-5, atol=1e-5)
    np.testing.assert_allclose(np.asarray(h), np.asarray(h_ref), rtol=1e-5, atol=1e-5)

    # Secondary check: multi-step recurrence (T = 4) exercises the unrolled loop.
    T2 = 4
    x2 = jax.random.normal(kx2, (B, T2, D), jnp.float32)
    y2, h2 = fwd(x2, params, tags=tags)
    y2 = jax.block_until_ready(y2)
    h2 = jax.block_until_ready(h2)
    y2_ref, h2_ref = ner_net_reference(x2, raw_params)
    np.testing.assert_allclose(np.asarray(y2), np.asarray(y2_ref), rtol=1e-5, atol=1e-5)
    np.testing.assert_allclose(np.asarray(h2), np.asarray(h2_ref), rtol=1e-5, atol=1e-5)

    print("KERNEL_OK")
</pallas_src>

<mosaic_0001>
module attributes {stable_mosaic.version = 11 : i64} {
  func.func @_ner_net_kernel(%arg0: memref<8x1x32xf32, #tpu.memory_space<vmem>>, %arg1: memref<32x128xf32, #tpu.memory_space<vmem>>, %arg2: memref<32x128xf32, #tpu.memory_space<vmem>>, %arg3: memref<1x128xf32, #tpu.memory_space<vmem>>, %arg4: memref<32x128xf32, #tpu.memory_space<vmem>>, %arg5: memref<1x128xf32, #tpu.memory_space<vmem>>, %arg6: memref<8x32xf32, #tpu.memory_space<vmem>>, %arg7: memref<8x128xf32, #tpu.memory_space<vmem>>) attributes {dimension_semantics = [], scalar_prefetch = 0 : i64, scratch_operands = 0 : i64, tpu.core_type = #tpu.core_type<tc>} {
    %c0 = arith.constant 0 : index
    %c0_0 = arith.constant 0 : index
    %c0_1 = arith.constant 0 : index
    %0 = vector.load %arg0[%c0, %c0_0, %c0_1] : memref<8x1x32xf32, #tpu.memory_space<vmem>>, vector<8x1x32xf32>
    %1 = vector.shape_cast %0 : vector<8x1x32xf32> to vector<8x32xf32>
    %c0_2 = arith.constant 0 : index
    %c0_3 = arith.constant 0 : index
    %2 = vector.load %arg1[%c0_2, %c0_3] : memref<32x128xf32, #tpu.memory_space<vmem>>, vector<32x128xf32>
    %cst = arith.constant dense<0.000000e+00> : vector<8x128xf32>
    %3 = tpu.matmul %1, %2, %cst {dimension_numbers = #tpu.dot_dimension_numbers<[1], [0], [0], [1], [0, 0, 1, 1], [], []>} : vector<8x32xf32>, vector<32x128xf32>, vector<8x128xf32> -> vector<8x128xf32>
    %c0_4 = arith.constant 0 : index
    %c0_5 = arith.constant 0 : index
    %4 = vector.load %arg3[%c0_4, %c0_5] : memref<1x128xf32, #tpu.memory_space<vmem>>, vector<1x128xf32>
    %5 = vector.broadcast %4 : vector<1x128xf32> to vector<8x128xf32>
    %6 = arith.addf %3, %5 : vector<8x128xf32>
    %7 = tpu.iota {dimensions = array<i32: 1>} : vector<8x128xi32>
    %c64_i32 = arith.constant 64 : i32
    %8 = vector.broadcast %c64_i32 : i32 to vector<8x128xi32>
    %9 = arith.cmpi sge, %7, %8 : vector<8x128xi32>
    %c96_i32 = arith.constant 96 : i32
    %10 = vector.broadcast %c96_i32 : i32 to vector<8x128xi32>
    %11 = arith.cmpi slt, %7, %10 : vector<8x128xi32>
    %12 = arith.andi %9, %11 : vector<8x128xi1>
    %cst_6 = arith.constant 1.000000e+00 : f32
    %cst_7 = arith.constant 5.000000e-01 : f32
    %13 = vector.broadcast %cst_6 : f32 to vector<8x128xf32>
    %14 = vector.broadcast %cst_7 : f32 to vector<8x128xf32>
    %15 = arith.select %12, %13, %14 : vector<8x128xi1>, vector<8x128xf32>
    %cst_8 = arith.constant 0.000000e+00 : f32
    %cst_9 = arith.constant 5.000000e-01 : f32
    %16 = vector.broadcast %cst_8 : f32 to vector<8x128xf32>
    %17 = vector.broadcast %cst_9 : f32 to vector<8x128xf32>
    %18 = arith.select %12, %16, %17 : vector<8x128xi1>, vector<8x128xf32>
    %19 = arith.mulf %6, %15 : vector<8x128xf32>
    %20 = math.tanh %19 : vector<8x128xf32>
    %21 = arith.mulf %20, %15 : vector<8x128xf32>
    %22 = arith.addf %21, %18 : vector<8x128xf32>
    %23 = vector.extract_strided_slice %22 {offsets = [0, 0], sizes = [8, 32], strides = [1, 1]} : vector<8x128xf32> to vector<8x32xf32>
    %24 = vector.extract_strided_slice %22 {offsets = [0, 64], sizes = [8, 32], strides = [1, 1]} : vector<8x128xf32> to vector<8x32xf32>
    %25 = vector.extract_strided_slice %22 {offsets = [0, 96], sizes = [8, 32], strides = [1, 1]} : vector<8x128xf32> to vector<8x32xf32>
    %26 = arith.mulf %23, %24 : vector<8x32xf32>
    %27 = math.tanh %26 : vector<8x32xf32>
    %28 = arith.mulf %25, %27 : vector<8x32xf32>
    %cst_10 = arith.constant 0.000000e+00 : f32
    %29 = vector.broadcast %cst_10 : f32 to vector<8x32xf32>
    %30 = arith.cmpf oge, %28, %29 : vector<8x32xf32>
    %cst_11 = arith.constant 0.00999999977 : f32
    %31 = vector.broadcast %cst_11 : f32 to vector<8x32xf32>
    %32 = arith.mulf %31, %28 : vector<8x32xf32>
    %33 = arith.select %30, %28, %32 : vector<8x32xi1>, vector<8x32xf32>
    %c0_12 = arith.constant 0 : index
    %c0_13 = arith.constant 0 : index
    %34 = vector.load %arg6[%c0_12, %c0_13] : memref<8x32xf32, #tpu.memory_space<vmem>>, vector<8x32xf32>
    tpu.vector_store %arg6[%c0_12, %c0_13], %33 {strides = array<i32>} : memref<8x32xf32, #tpu.memory_space<vmem>>, vector<8x32xf32>,
    %c0_14 = arith.constant 0 : index
    %c0_15 = arith.constant 0 : index
    %35 = vector.load %arg4[%c0_14, %c0_15] : memref<32x128xf32, #tpu.memory_space<vmem>>, vector<32x128xf32>
    %cst_16 = arith.constant dense<0.000000e+00> : vector<8x128xf32>
    %36 = tpu.matmul %33, %35, %cst_16 {dimension_numbers = #tpu.dot_dimension_numbers<[1], [0], [0], [1], [0, 0, 1, 1], [], []>} : vector<8x32xf32>, vector<32x128xf32>, vector<8x128xf32> -> vector<8x128xf32>
    %c0_17 = arith.constant 0 : index
    %c0_18 = arith.constant 0 : index
    %37 = vector.load %arg5[%c0_17, %c0_18] : memref<1x128xf32, #tpu.memory_space<vmem>>, vector<1x128xf32>
    %38 = vector.broadcast %37 : vector<1x128xf32> to vector<8x128xf32>
    %39 = arith.addf %36, %38 : vector<8x128xf32>
    %c0_19 = arith.constant 0 : index
    %c0_20 = arith.constant 0 : index
    %40 = vector.load %arg7[%c0_19, %c0_20] : memref<8x128xf32, #tpu.memory_space<vmem>>, vector<8x128xf32>
    tpu.vector_store %arg7[%c0_19, %c0_20], %39 {strides = array<i32>} : memref<8x128xf32, #tpu.memory_space<vmem>>, vector<8x128xf32>,
    return
  }
}

</mosaic_0001>

<bundles_post_ra>
// kernel: ner_net_forward.1
= control target key start
LH: loop header
LB: loop body
LE: loop exit
PB: predicated region body
PF: predicated region fallthrough
CT: control target
= control target key end

     0   :  { %13 = vsyncpa [#allocation3], 0  ;;  %s545_s0 = inlined_call_operand.hbm [shape: f32[8,1,32], index: 0, kind: input, shape index: {}]   ;;  %s546_s1 = inlined_call_operand.hbm [shape: f32[32,128], index: 1, kind: input, shape index: {}]   ;;  %s547_s2 = inlined_call_operand.hbm [shape: f32[32,128], index: 2, kind: input, shape index: {}]   ;;  %s548_s3 = inlined_call_operand.vmem [shape: f32[1,128], index: 3, kind: input, shape index: {}]   ;;  %s549_s4 = inlined_call_operand.hbm [shape: f32[32,128], index: 4, kind: input, shape index: {}]   ;;  %s550_s5 = inlined_call_operand.hbm [shape: f32[1,128], index: 5, kind: input, shape index: {}]   ;;  %s551_s6 = inlined_call_operand.hbm [shape: f32[8,32], index: 6, kind: output, shape index: {0}]   ;;  %s552_s7 = inlined_call_operand.hbm [shape: f32[8,128], index: 7, kind: output, shape index: {1}]  }
   0x1   :  { %14 = vsyncpa [#allocation6], 0 }
   0x2   :  { %15 = vsyncpa [#allocation9], 0 }
   0x3   :  { %16 = vsyncpa [#allocation4], 0  ;;  %s35_s26 = sshll.u32 %s546_s1, 4  ;;  %s36_s26 = int_to_ptr.hbm [resolvable:$true] %s35_s26 }
   0x4   :  { %17 = vsyncpa [#allocation13], 0  ;;  %s463_s27 = smov [#allocation5]   ;;  %s63_s8 = sshll.u32 %s549_s4, 4  ;;  %s64_s8 = int_to_ptr.hbm [resolvable:$true] %s63_s8 }
   0x5   :  { %s37_s28 = sshll.u32 %s463_s27, 4  ;;  %s464_s9 = smov 128   ;;  %s38_s28 = int_to_ptr.vmem [resolvable:$true] %s37_s28 }
   0x6   :  { %s465_s10 = smov 8   ;;  %s466_s11 = smov [#allocation8]  }
   0x7   :  { %43 = dma.hbm_to_vmem [thread:$0]  %s36_s26, 512, %s38_s28, [#allocation6], %s464_s9, %s464_s9, %s465_s10  }
   0x8   :  { %s65_s12 = sshll.u32 %s466_s11, 4  ;;  %s22_s15 = sshll.u32 %s545_s0, 4  ;;  %s66_s12 = int_to_ptr.vmem [resolvable:$true] %s65_s12  ;;  %s23_s15 = int_to_ptr.hbm [resolvable:$true] %s22_s15 }
   0x9   :  { %71 = dma.hbm_to_vmem [thread:$0]  %s64_s8, 512, %s66_s12, [#allocation9], %s464_s9, %s464_s9, %s465_s10  }
   0xa   :  { %s467_s1 = smov [#allocation2]   ;;  %s48_s4 = sshll.u32 %s547_s2, 4  ;;  %s49_s4 = int_to_ptr.hbm [resolvable:$true] %s48_s4 }
   0xb   :  { %s24_s16 = sshll.u32 %s467_s1, 4  ;;  %s468_s19 = smov 16   ;;  %s25_s16 = int_to_ptr.vmem [resolvable:$true] %s24_s16 }
   0xc   :  { %s469_s20 = smov 1   ;;  %s470_s21 = smov [#allocation7]  }
   0xd   :  { %30 = dma.hbm_to_vmem [thread:$0]  %s23_s15, 128, %s25_s16, [#allocation3], %s468_s19, %s468_s19, %s469_s20  }
   0xe   :  { %s50_s22 = sshll.u32 %s470_s21, 4  ;;  %s77_s0 = sshll.u32 %s550_s5, 4  ;;  %s51_s22 = int_to_ptr.vmem [resolvable:$true] %s50_s22  ;;  %s78_s0 = int_to_ptr.hbm [resolvable:$true] %s77_s0 }
   0xf   :  { %56 = dma.hbm_to_vmem [thread:$0]  %s49_s4, 512, %s51_s22, [#allocation6], %s464_s9, %s464_s9, %s465_s10  }
  0x10   :  { %s471_s25 = smov [#allocation10]  }
  0x11   :  { %s79_s26 = sshll.u32 %s471_s25, 4  ;;  %s80_s26 = int_to_ptr.vmem [resolvable:$true] %s79_s26 }
  0x12   :  { %82 = dma.hbm_to_vmem [thread:$0]  %s78_s0, 16, %s80_s26, [#allocation9]  }
  0x13   :  { %453 = dma.done.wait [#allocation3], 128  }
  0x14   :  { %454 = vsyncadd [#allocation3], 4294967168 }
  0x15   :  { %455 = dma.done.wait [#allocation6], 1024  }
  0x16   :  { %456 = vsyncadd [#allocation6], 4294966272 }
  0x17   :  { %457 = dma.done.wait [#allocation9], 528  }
  0x18   :  { %458 = vsyncadd [#allocation9], 4294966768  ;;  %v114_v0 = vld [vmem:[#allocation5 + $0x18] sm:$0xff]  ;;  %v113_v1 = vld [vmem:[#allocation5 + $0x10] sm:$0xff]  ;;  %vm143_vm0 = vcmask 261120   ;;  %v166_v13 = vlaneseq  ;;  %v472_v17 = vmov 0.5  }
  0x19   :  { %158 = vmatpush.msra.mxu0 %v114_v0  ;;  %v103_v2 = vld [vmem:[#allocation2] sm:$0x1]  ;;  %v112_v3 = vld [vmem:[#allocation5 + $0x8] sm:$0xff]  ;;  %v104_v4 = vld [vmem:[#allocation2 + $0x1] sm:$0x1]  ;;  %s473_s27 = smov 64  }
  0x1a   :  { %v111_v5 = vld [vmem:[#allocation5] sm:$0xff]  ;;  %v105_v6 = vld [vmem:[#allocation2 + $0x2] sm:$0x1]  ;;  %v106_v7 = vld [vmem:[#allocation2 + $0x3] sm:$0x1]  ;;  %v167_v14 = vand.u32 127, %v166_v13 }
  0x1b   :  { %159 = vmatpush.msra.mxu0 %v113_v1  ;;  %127 = vst [vmem:[#allocation1] ss:$9 sm:$0xff] %v103_v2  ;;  %v107_v8 = vld [vmem:[#allocation2 + $0x4] sm:$0x1]  ;;  %v108_v9 = vld [vmem:[#allocation2 + $0x5] sm:$0x1] }
  0x1c   :  { %129 = vst [vmem:[#allocation1 + $0x1] ss:$9 sm:$0xff] %v104_v4  ;;  %v109_v10 = vld [vmem:[#allocation2 + $0x6] sm:$0x1]  ;;  %v110_v11 = vld [vmem:[#allocation2 + $0x7] sm:$0x1] }
  0x1d   :  { %160 = vmatpush.msra.mxu0 %v112_v3  ;;  %131 = vst [vmem:[#allocation1 + $0x2] ss:$9 sm:$0xff] %v105_v6  ;;  %vm168_vm1 = vcmp.ge.s32.totalorder %v167_v14, 64  ;;  %vm169_vm2 = vcmp.lt.s32.totalorder %v167_v14, 96  ;;  %v279_v15 = vld [vmem:[%s548_s3] ss:$0 sm:$0xff] }
  0x1e   :  { %133 = vst [vmem:[#allocation1 + $0x3] ss:$9 sm:$0xff] %v106_v7  ;;  %vm170_vm3 = vmand %vm168_vm1, %vm169_vm2  ;;  %s474_s28 = smov 96   ;;  %v199_v28 = vld [vmem:[#allocation8 + $0x18] sm:$0xff]  ;;  %v198_v29 = vld [vmem:[#allocation8 + $0x10] sm:$0xff]  ;;  %s475_s3 = smov 32  }
  0x1f   :  { %161 = vmatpush.msra.mxu0 %v111_v5  ;;  %135 = vst [vmem:[#allocation1 + $0x4] ss:$9 sm:$0xff] %v107_v8  ;;  %v171_v18 = vsel %vm170_vm3, 1.0, %v472_v17  ;;  %v172_v22 = vsel %vm170_vm3, 0.0, %v472_v17  ;;  %218 = vmatpush.msra.mxu1 %v199_v28  ;;  %v197_v30 = vld [vmem:[#allocation8 + $0x8] sm:$0xff]  ;;  %v196_v31 = vld [vmem:[#allocation8] sm:$0xff] }
  0x20   :  { %137 = vst [vmem:[#allocation1 + $0x5] ss:$9 sm:$0xff] %v108_v9  ;;  %s476_s29 = smov [#allocation11]   ;;  %s234_s10 = sshll.u32 %s551_s6, 4  ;;  %v280_v37 = vld [vmem:[#allocation10] ss:$0 sm:$0xff]  ;;  %s235_s10 = int_to_ptr.hbm [resolvable:$true] %s234_s10 }
  0x21   :  { %139 = vst [vmem:[#allocation1 + $0x6] ss:$9 sm:$0xff] %v109_v10  ;;  %219 = vmatpush.msra.mxu1 %v198_v29  ;;  %s232_s30 = sshll.u32 %s476_s29, 4  ;;  %s477_s11 = smov [#allocation12]   ;;  %s233_s30 = int_to_ptr.vmem [resolvable:$true] %s232_s30 }
  0x22   :  { %141 = vst [vmem:[#allocation1 + $0x7] ss:$9 sm:$0xff] %v110_v11  ;;  %s243_s12 = sshll.u32 %s477_s11, 4  ;;  %s245_s15 = sshll.u32 %s552_s7, 4  ;;  %s244_s12 = int_to_ptr.vmem [resolvable:$true] %s243_s12  ;;  %s246_s15 = int_to_ptr.hbm [resolvable:$true] %s245_s15 }
  0x23   :  { %220 = vmatpush.msra.mxu1 %v197_v30 }
  0x25   :  { %221 = vmatpush.msra.mxu1 %v196_v31 }
  0x29   :  { %v142_v12 = vld [vmem:[#allocation1] sm:$0xff] }
  0x2a   :  { %262 = vmatmul.msk.f32.vlgmr.msra.gmra.mxu0 %vm143_vm0, %v142_v12 }
  0xa7   :  { %v163_v16 = vpop.f32.mrf.mxu0 }
  0xa8   :  { %v164_v19 = vadd.f32 %v279_v15, %v163_v16 }
  0xaa   :  { %v173_v20 = vmul.f32 %v171_v18, %v164_v19 }
  0xac   :  { %281 = vtanh.f32 %v173_v20 }
  0xb2   :  { %v282_v21 = vpop.eup %281 }
  0xb3   :  { %v175_v23 = vmul.f32 %v282_v21, %v171_v18 }
  0xb5   :  { %v176_v24 = vadd.f32 %v175_v23, %v172_v22 }
  0xb7   :  { %178 = vrot.lane.b32.xlu0 %v176_v24, %s473_s27 }
 0x129   :  { %v179_v25 = vpop.permute.xlu0 %178 }
 0x12a   :  { %v181_v26 = vmul.f32 %v179_v25, %v176_v24 }
 0x12c   :  { %283 = vtanh.f32 %v181_v26 }
 0x132   :  { %v284_v27 = vpop.eup %283 }
 0x133   :  { %184 = vrot.lane.b32.xlu0 %v284_v27, %s474_s28 }
 0x1a5   :  { %v185_v32 = vpop.permute.xlu0 %184 }
 0x1a6   :  { %v187_v33 = vmul.f32 %v185_v32, %v176_v24 }
 0x1a8   :  { %vm188_vm4 = vcmp.ge.f32.partialorder %v187_v33, 0.0  ;;  %v189_v34 = vmul.f32 0.01, %v187_v33 }
 0x1aa   :  { %v190_v35 = vsel %vm188_vm4, %v187_v33, %v189_v34 }
 0x1ab   :  { %192 = vrot.lane.b32.xlu1 %v190_v35, %s475_s3 }
 0x21d   :  { %v193_v36 = vpop.permute.xlu1 %192 }
 0x21e   :  { %195 = vst.msk [vmem:[#allocation11] sm:$0xff] %vm143_vm0, %v193_v36  ;;  %263 = vmatmul.msk.f32.vlgmr.msra.gmra.mxu1 %vm143_vm0, %v193_v36 }
 0x21f   :  { %237 = dma.vmem_to_hbm [thread:$0]  %s233_s30, 128, %s235_s10, [#allocation4]  }
 0x29b   :  { %v223_v38 = vpop.f32.mrf.mxu1 }
 0x29c   :  { %v224_v39 = vadd.f32 %v280_v37, %v223_v38 }
 0x29e   :  { %226 = vst [vmem:[#allocation12] sm:$0xff] %v224_v39 }
 0x29f   :  { %248 = dma.vmem_to_hbm [thread:$0]  %s244_s12, 128, %s246_s15, [#allocation13]  }
 0x2a0   :  { %459 = dma.done.wait [#allocation4], 128  }
 0x2a1   :  { %460 = vsyncadd [#allocation4], 4294967168 }
 0x2a2   :  { %461 = dma.done.wait [#allocation13], 128  }
 0x2a3   :  { %462 = vsyncadd [#allocation13], 4294967168 }
 0x2a4   :  { %257 = vsyncpa [#allocation3], 1 }
 0x2a5   :  { %258 = vsyncpa [#allocation6], 1 }
 0x2a6   :  { %259 = vsyncpa [#allocation9], 1 }
 0x2a7   :  { %260 = vsyncpa [#allocation4], 1 }
 0x2a8   :  { %261 = vsyncpa [#allocation13], 1 }

</bundles_post_ra>
